<compile_context>
chip_gen: v7x
topology: tpu7x:2x2x1
jax: 0.10.0
libtpu: 0.0.40
codegen_flags: <defaults>
</compile_context>

<pallas_src>
import jax
import jax.numpy as jnp
from jax.experimental import pallas as pl
from jax.experimental.pallas import tpu as pltpu

_LANES = 128  # vreg lane width


def _round_up(a, b):
    return ((a + b - 1) // b) * b


def _mish_kernel(x_ref, o_ref):
    # x_ref / o_ref : [TR, 128] tiles
    x = x_ref[...].astype(jnp.float32)
    # mish(x) = x * tanh(softplus(x)).  Rewrite tanh(softplus(x)) as a rational
    # function of w = exp(-|x|) (always in (0, 1], no overflow anywhere):
    #   x <= 0 (w = e^x)   : (w^2 + 2w) / (w^2 + 2w + 2)
    #   x >  0 (w = e^-x)  : (1 + 2w)   / (1 + 2w + 2w^2)
    # -> one exp + one reciprocal on the EUP; the rest is cheap VALU work.
    w = jnp.exp(-jnp.abs(x))
    w2 = w * w
    pos = x > 0.0
    num = jnp.where(pos, 1.0 + 2.0 * w, w2 + 2.0 * w)
    den = jnp.where(pos, num + 2.0 * w2, num + 2.0)
    y = x * (num / den)
    o_ref[...] = y.astype(o_ref.dtype)


def mish_pallas(x, *, block_bytes=2 * 1024 * 1024):
    """Elementwise Mish over an arbitrary-shaped array via a lane-dense 2-D kernel."""
    orig_shape = x.shape
    dtype = x.dtype
    itemsize = jnp.dtype(dtype).itemsize
    n = x.size
    if n == 0:
        return x

    flat = x.reshape(-1)

    # Pad only when numel isn't a multiple of the 128-lane width.  Typical NN
    # activation sizes are lane-aligned, so this path usually costs nothing.
    # TODO(synk): a manual-DMA tail (memory_space=pl.ANY) would remove this
    # copy for odd sizes as well.
    pad = (-n) % _LANES
    if pad:
        flat = jnp.pad(flat, (0, pad))
    rows = flat.size // _LANES
    x2 = flat.reshape(rows, _LANES)

    # Sublane packing multiple: 8 for 4-byte, 16 for 2-byte, 32 for 1-byte dtypes.
    sub = max(8, 32 // itemsize)

    # Row tile targeting ~block_bytes per block, rounded to the sublane multiple.
    tr = max(sub, (block_bytes // (_LANES * itemsize)) // sub * sub)
    # Keep >= 2 grid steps when the array allows it (v7x: 2 TensorCores share
    # the "parallel" axis; also keeps the DMA pipeline busy).
    if rows > sub:
        tr = min(tr, _round_up(pl.cdiv(rows, 2), sub))
    tr = min(tr, _round_up(rows, sub))

    grid = (pl.cdiv(rows, tr),)  # last block may be partial -> masked by Pallas

    out2 = pl.pallas_call(
        _mish_kernel,
        out_shape=jax.ShapeDtypeStruct((rows, _LANES), dtype),
        grid_spec=pltpu.PrefetchScalarGridSpec(
            num_scalar_prefetch=0,
            grid=grid,
            in_specs=[pl.BlockSpec((tr, _LANES), lambda i: (i, 0))],
            out_specs=pl.BlockSpec((tr, _LANES), lambda i: (i, 0)),
        ),
        compiler_params=pltpu.CompilerParams(
            dimension_semantics=("parallel",)),
    )(x2)

    out = out2.reshape(-1)
    if pad:
        out = out[:n]
    return out.reshape(orig_shape)


if __name__ == "__main__":
    key = jax.random.PRNGKey(0)

    # Main check: small activation tensor [B, C, H, W], f32, lane-aligned size.
    x = jax.random.normal(key, (2, 4, 16, 16), dtype=jnp.float32) * 3.0
    out = jax.block_until_ready(mish_pallas(x))
    ref = x * jnp.tanh(jax.nn.softplus(x))
    assert out.shape == x.shape
    assert jnp.allclose(out, ref, atol=1e-5, rtol=1e-5)

    # Secondary check: ragged size (not a multiple of 128) + bf16 dtype,
    # exercising the pad path, the partial-row boundary block, and the f32
    # upcast inside the kernel.
    k2 = jax.random.PRNGKey(1)
    xb = (jax.random.normal(k2, (3, 5, 7), dtype=jnp.float32) * 2.0).astype(jnp.bfloat16)
    outb = jax.block_until_ready(mish_pallas(xb))
    xb32 = xb.astype(jnp.float32)
    refb = (xb32 * jnp.tanh(jax.nn.softplus(xb32))).astype(jnp.bfloat16)
    assert outb.shape == xb.shape
    assert jnp.allclose(outb.astype(jnp.float32), refb.astype(jnp.float32),
                        atol=1e-2, rtol=5e-2)

    print("KERNEL_OK")
</pallas_src>

<mosaic_0001>
module attributes {stable_mosaic.version = 11 : i64} {
  func.func @_mish_kernel(%arg0: i32, %arg1: memref<8x128xf32, #tpu.memory_space<vmem>>, %arg2: memref<8x128xf32, #tpu.memory_space<vmem>>) attributes {dimension_semantics = [#tpu.dimension_semantics<parallel>], iteration_bounds = array<i64: 2>, scalar_prefetch = 0 : i64, scratch_operands = 0 : i64, tpu.core_type = #tpu.core_type<tc>, window_params = [{transform_indices = @transform_0, window_bounds = array<i64: 8, 128>}, {transform_indices = @transform_1, window_bounds = array<i64: 8, 128>}]} {
    %c0 = arith.constant 0 : index
    %c0_0 = arith.constant 0 : index
    %0 = vector.load %arg1[%c0, %c0_0] : memref<8x128xf32, #tpu.memory_space<vmem>>, vector<8x128xf32>
    %1 = math.absf %0 : vector<8x128xf32>
    %cst = arith.constant 0.000000e+00 : f32
    %2 = vector.broadcast %cst : f32 to vector<8x128xf32>
    %3 = arith.subf %2, %1 : vector<8x128xf32>
    %4 = math.exp %3 : vector<8x128xf32>
    %5 = arith.mulf %4, %4 : vector<8x128xf32>
    %cst_1 = arith.constant 0.000000e+00 : f32
    %6 = vector.broadcast %cst_1 : f32 to vector<8x128xf32>
    %7 = arith.cmpf ogt, %0, %6 : vector<8x128xf32>
    %cst_2 = arith.constant 2.000000e+00 : f32
    %8 = vector.broadcast %cst_2 : f32 to vector<8x128xf32>
    %9 = arith.mulf %8, %4 : vector<8x128xf32>
    %cst_3 = arith.constant 1.000000e+00 : f32
    %10 = vector.broadcast %cst_3 : f32 to vector<8x128xf32>
    %11 = arith.addf %10, %9 : vector<8x128xf32>
    %cst_4 = arith.constant 2.000000e+00 : f32
    %12 = vector.broadcast %cst_4 : f32 to vector<8x128xf32>
    %13 = arith.mulf %12, %4 : vector<8x128xf32>
    %14 = arith.addf %5, %13 : vector<8x128xf32>
    %15 = arith.select %7, %11, %14 : vector<8x128xi1>, vector<8x128xf32>
    %cst_5 = arith.constant 2.000000e+00 : f32
    %16 = vector.broadcast %cst_5 : f32 to vector<8x128xf32>
    %17 = arith.mulf %16, %5 : vector<8x128xf32>
    %18 = arith.addf %15, %17 : vector<8x128xf32>
    %cst_6 = arith.constant 2.000000e+00 : f32
    %19 = vector.broadcast %cst_6 : f32 to vector<8x128xf32>
    %20 = arith.addf %15, %19 : vector<8x128xf32>
    %21 = arith.select %7, %18, %20 : vector<8x128xi1>, vector<8x128xf32>
    %22 = arith.divf %15, %21 : vector<8x128xf32>
    %23 = arith.mulf %0, %22 : vector<8x128xf32>
    %c0_7 = arith.constant 0 : index
    %c0_8 = arith.constant 0 : index
    %24 = vector.load %arg2[%c0_7, %c0_8] : memref<8x128xf32, #tpu.memory_space<vmem>>, vector<8x128xf32>
    tpu.vector_store %arg2[%c0_7, %c0_8], %23 {strides = array<i32>} : memref<8x128xf32, #tpu.memory_space<vmem>>, vector<8x128xf32>,
    return
  }
  func.func @transform_0(%arg0: i32) -> (i32, i32) {
    %c0_i32 = arith.constant 0 : i32
    %c0_i32_0 = arith.constant 0 : i32
    return %arg0, %c0_i32 : i32, i32
  }
  func.func @transform_1(%arg0: i32) -> (i32, i32) {
    %c0_i32 = arith.constant 0 : i32
    %c0_i32_0 = arith.constant 0 : i32
    return %arg0, %c0_i32 : i32, i32
  }
}

</mosaic_0001>

<bundles_post_ra>
// kernel: tpu_custom_call.1
= control target key start
LH: loop header
LB: loop body
LE: loop exit
PB: predicated region body
PF: predicated region fallthrough
CT: control target
= control target key end

     0   :  { %6 = vsyncpa [#allocation3], 0  ;;  %s568_s0 = inlined_call_operand.hbm [shape: f32[16,128], index: 0, kind: input, shape index: {}]   ;;  %s569_s1 = inlined_call_operand.hbm [shape: f32[16,128], index: 1, kind: output, shape index: {}]  }
   0x1   :  { %8 = vsyncpa [#allocation3 + $0x1], 0 }
   0x2   :  { %9 = vsyncpa [#allocation4], 0 }
   0x3   :  { %11 = vsyncpa [#allocation4 + $0x1], 0  ;;  %s407_s6 = smov 0   ;;  %s409_s7 = smov 0  }
   0x4   :  { %s411_s8 = smov 0   ;;  %s413_s9 = smov 0  }
   0x5 LB: > { %s428_s10 = sadd.s32 4294967295, %s393_s9   ;;  %s235_s11 = sadd.s32 4294967294, %s393_s9   ;;  %s393_s9 = sphi %s413_s9, %s584_s9   ;;  %s389_s8 = sphi %s411_s8, %s583_s8   ;;  %s385_s7 = sphi %s409_s7, %s582_s7   ;;  %s381_s6 = sphi %s407_s6, %s581_s6  }
   0x6   : > { %s432_s12 = sadd.s32 1, %s393_s9   ;;  %s24_s13 = sadd.s32 1, %s389_s8 }
   0x7   : > { %s21_s14 = ssub.s32 %s393_s9, %s432_s12  ;;  %p31_p0 = scmp.ne.s32.totalorder %s389_s8, %s385_s7 }
   0x8   : > { %p22_p1 = scmp.eq.s32.totalorder %s21_s14, 0  ;;  %p32_p2 = scmp.eq.s32.totalorder %s393_s9, 0 }
   0x9   : > { %p37_p3 = scmp.ne.s32.totalorder %s385_s7, %s381_s6  ;;  %p38_p4 = scmp.eq.s32.totalorder %s428_s10, 0 }
   0xa   : > { %s444_s15 = scalar_select %p22_p1, %s389_s8, %s24_s13  }
   0xb   : > { %p446_p5 = por %p32_p2, %p31_p0  ;;  %p450_p6 = por %p38_p4, %p37_p3 }
   0xc   : > { %p61_p7 = scmp.eq.s32.totalorder %s428_s10, 1  ;;  %p67_p8 = scmp.eq.s32.totalorder %s235_s11, 1 }
   0xd   : > { %p259_p10 = scmp.lt.s32.totalorder %s393_s9, 2  ;;  %s87_s20 = sand.u32 1, %s389_s8  }
   0xe   : > { %p457_p11 = por %p61_p7, %p31_p0  ;;  %p461_p12 = por %p67_p8, %p37_p3 }
   0xf   : > { %s239_s21 = sshll.u32 %s393_s9, 7  ;;  %s238_s22 = sshll.u32 %s87_s20, 3 }
  0x10   : > { %s573_s18 = scalar_select %p457_p11, 1, 0 }
  0x11   : > { %s574_s19 = scalar_select %p461_p12, 1, 0 }
  0x12   : > { %s470_s25 = scalar_lea.hbm %s568_s0, %s239_s21  ;;  %s91_s26 = scalar_lea.vmem [#allocation2], %s238_s22 }
  0x13   : > { %s98_s27 = sshll.u32 %s91_s26, 4  ;;  %p474_p13 = pnand %p259_p10, %p446_p5  ;;  %s478_s27 = int_to_ptr.vmem [resolvable:$true] %s98_s27 }
  0x14   : > { %s88_s29 = scalar_lea.sflag [#allocation3], %s87_s20  ;;  %s297_s30 = scalar_lea.hbm %s470_s25, 128 }
  0x15   : > { %p298_p2 = scmp.ne.s32.totalorder %s470_s25, %s297_s30  ;;  %p299_p3 = pneg %p474_p13 }
  0x16   : > { %s302_s4 = scalar_lea.hbm %s568_s0, 256  ;;  %p303_p5 = scmp.lt.u32.totalorder %s470_s25, %s568_s0 }
  0x17   : > { %p300_p4 = pnand %p299_p3, %p298_p2  ;;  %p304_p8 = scmp.lt.u32.totalorder %s302_s4, %s297_s30 }
  0x18   : > { %p306_p9 = scmp.lt.u32.totalorder %s297_s30, %s470_s25 }
  0x19   : > { %p301_p7 = pneg %p300_p4  ;;  %p305_p10 = por %p304_p8, %p303_p5 }
  0x1b   : > { %p307_p0 = por %p306_p9, %p305_p10 }
  0x1d   : > { %p308_p1 = pnand %p307_p0, %p301_p7 }
  0x1f   : > { %311 = shalt.err (!%p308_p1)
}
  0x20   : > { %s312_s13 = scalar_lea.vmem %s478_s27, 128  ;;  %s395_s14 = smov [#allocation2]  }
  0x21   : > { %p313_p2 = scmp.ne.s32.totalorder %s478_s27, %s312_s13  ;;  %s317_s16 = sshll.u32 %s395_s14, 4  ;;  %s318_s16 = int_to_ptr.vmem [resolvable:$false] %s317_s16 }
  0x22   : > { %s319_s20 = scalar_lea.vmem %s318_s16, 256  ;;  %p320_p11 = scmp.lt.s32.totalorder %s478_s27, %s318_s16 }
  0x23   : > { %p315_p4 = pnand %p313_p2, %p299_p3  ;;  %p321_p5 = scmp.lt.s32.totalorder %s319_s20, %s312_s13 }
  0x25   : > { %p316_p12 = pneg %p315_p4  ;;  %p322_p8 = por %p321_p5, %p320_p11 }
  0x27   : > { %p323_p9 = pnand %p322_p8, %p316_p12 }
  0x29   : > { %326 = shalt.err (!%p323_p9)
}
  0x2a   : > { %254 = dma.hbm_to_vmem [thread:$0]  (!%p474_p13), %s470_s25, 128, %s478_s27, %s88_s29  }
  0x2b   : > { %p576_p0 = scmp.lt.s32.totalorder %s393_s9, 3  ;;  %p577_p1 = scmp.ge.s32.totalorder %s393_s9, 1 }
  0x2d   : > { %p104_p3 = pnand %p577_p1, %p576_p0 }
  0x2e   : > { %s512_s21 = sand.u32 (!%p104_p3), 1, %s385_s7  }
  0x2f   : > { %107 = sbr.rel (%p104_p3) target bundleno = 110 (0x6e), region = 24  ;;  %s241_s22 = sshll.u32 (!%p104_p3), %s512_s21, 3 }
  0x30   : > { %s110_s23 = scalar_lea.sflag (!%p104_p3), [#allocation3], %s512_s21  ;;  %s113_s24 = scalar_lea.vmem (!%p104_p3), [#allocation2], %s241_s22 }
  0x36   : > { %372 = dma.done.wait (%p450_p6), %s110_s23, 128  }
  0x37   : > { %374 = vsyncadd (%p450_p6), %s110_s23, 4294967168  ;;  %v132_v0 = vld [vmem:[%s113_s24] sm:$0xff]  ;;  %s131_s17 = scalar_lea.vmem [#allocation5], %s241_s22  ;;  %s244_s26 = sshll.u32 %s428_s10, 7 }
  0x38   : > { %v133_v1 = vand.u32 2147483647, %v132_v0  ;;  %vm138_vm0 = vcmp.gt.f32.partialorder %v132_v0, 0.0  ;;  %s165_s25 = sshll.u32 %s131_s17, 4  ;;  %s526_s29 = scalar_lea.hbm %s569_s1, %s244_s26  ;;  %s521_s25 = int_to_ptr.vmem [resolvable:$true] %s165_s25 }
  0x39   : > { %s152_s30 = scalar_lea.sflag [#allocation4], %s512_s21  ;;  %s327_s2 = scalar_lea.vmem %s521_s25, 128 }
  0x3a   : > { %v134_v2 = vsub.f32 0.0, %v133_v1  ;;  %p328_p6 = scmp.ne.s32.totalorder %s521_s25, %s327_s2  ;;  %p578_p11 = scmp.ne.s32.totalorder %s573_s18, 0 }
  0x3b   : > { %s396_s10 = smov [#allocation5]  }
  0x3c   : > { %v135_v3 = vmul.f32 1.442695, %v134_v2  ;;  %p329_p12 = pnand %p328_p6, %p578_p11  ;;  %s331_s3 = sshll.u32 %s396_s10, 4  ;;  %s332_s3 = int_to_ptr.vmem [resolvable:$false] %s331_s3 }
  0x3d   : > { %s333_s4 = scalar_lea.vmem %s332_s3, 256  ;;  %p334_p7 = scmp.lt.s32.totalorder %s521_s25, %s332_s3 }
  0x3e   : > { %293 = vpow2.f32 %v135_v3  ;;  %p330_p13 = pneg %p329_p12  ;;  %p335_p10 = scmp.lt.s32.totalorder %s333_s4, %s327_s2 }
  0x40   : > { %p336_p2 = por %p335_p10, %p334_p7 }
  0x42   : > { %p337_p4 = pnand %p336_p2, %p330_p13 }
  0x48   : > { %v294_v4 = vpop.eup %293 }
  0x49   : > { %v137_v5 = vmul.f32 %v294_v4, %v294_v4  ;;  %v139_v6 = vmul.f32 2.0, %v294_v4 }
  0x4b   : > { %v140_v7 = vadd.f32 1.0, %v139_v6  ;;  %v141_v8 = vadd.f32 %v139_v6, %v137_v5  ;;  %v143_v9 = vmul.f32 2.0, %v137_v5 }
  0x4d   : > { %v142_v10 = vsel %vm138_vm0, %v140_v7, %v141_v8 }
  0x4e   : > { %v144_v11 = vadd.f32 %v143_v9, %v142_v10  ;;  %v145_v12 = vadd.f32 2.0, %v142_v10 }
  0x50   : > { %v146_v13 = vsel %vm138_vm0, %v144_v11, %v145_v12 }
  0x51   : > { %295 = vrcp.f32 %v146_v13 }
  0x5b   : > { %v296_v14 = vpop.eup %295 }
  0x5c   : > { %v148_v15 = vmul.f32 %v296_v14, %v142_v10 }
  0x5e   : > { %v149_v16 = vmul.f32 %v148_v15, %v132_v0 }
  0x60   : > { %150 = vst [vmem:[%s131_s17] sm:$0xff] %v149_v16 }
  0x61   : > { %340 = shalt.err (!%p337_p4)
}
  0x62   : > { %s341_s5 = scalar_lea.hbm %s526_s29, 128  ;;  %s345_s14 = scalar_lea.hbm %s569_s1, 256 }
  0x63   : > { %p342_p5 = scmp.ne.s32.totalorder %s526_s29, %s341_s5  ;;  %p346_p0 = scmp.lt.u32.totalorder %s526_s29, %s569_s1 }
  0x64   : > { %p347_p1 = scmp.lt.u32.totalorder %s345_s14, %s341_s5  ;;  %p349_p6 = scmp.lt.u32.totalorder %s341_s5, %s526_s29 }
  0x65   : > { %p343_p8 = pnand %p342_p5, %p578_p11 }
  0x66   : > { %p348_p3 = por %p347_p1, %p346_p0 }
  0x67   : > { %p344_p9 = pneg %p343_p8 }
  0x68   : > { %p350_p12 = por %p349_p6, %p348_p3 }
  0x6a   : > { %p351_p13 = pnand %p350_p12, %p344_p9 }
  0x6c   : > { %354 = shalt.err (!%p351_p13)
}
  0x6d   : > { %249 = dma.vmem_to_hbm [thread:$0]  (%p578_p11), %s521_s25, 128, %s526_s29, %s152_s30  }
  0x6e PF: > { %s177_s21 = sand.u32 1, %s381_s6   ;;  %p579_p7 = scmp.ne.s32.totalorder %s574_s19, 0 }
  0x6f   : > { %p580_p10 = scmp.ge.s32.totalorder %s393_s9, 2  ;;  %s178_s22 = scalar_lea.sflag [#allocation4], %s177_s21 }
  0x71   : > { %p256_p2 = pnand %p580_p10, %p579_p7 }
  0x73   : > { %376 = dma.done.wait (!%p256_p2), %s178_s22, 128  }
  0x74   : > { %378 = vsyncadd (!%p256_p2), %s178_s22, 4294967168  ;;  %p14_p4 = scmp.ge.s32.totalorder %s432_s12, 4   ;;  %s581_s6 = smov %s385_s7 }
  0x75   : > { %s582_s7 = smov %s389_s8  ;;  %s583_s8 = smov %s444_s15 }
  0x76   : > { %s584_s9 = smov %s432_s12  ;;  %16 = sbr.rel (!%p14_p4) target bundleno = 5 (0x5), region = 69 }
  0x7d   :  { %183 = vsyncpa [#allocation3], 1 }
  0x7e   :  { %185 = vsyncpa [#allocation3 + $0x1], 1 }
  0x7f   :  { %186 = vsyncpa [#allocation4], 1 }
  0x80   :  { %188 = vsyncpa [#allocation4 + $0x1], 1 }

</bundles_post_ra>
